<compile_context>
chip_gen: v7x
topology: tpu7x:2x2x1
jax: 0.10.0
libtpu: 0.0.40
codegen_flags: <defaults>
</compile_context>

<pallas_src>
import functools

import jax
import jax.numpy as jnp
from jax.experimental import pallas as pl
from jax.experimental.pallas import tpu as pltpu

_LANE = 128
_SUBLANE = 8


def _round_up(a, m):
    return (a + m - 1) // m * m


def _soft_nll_kernel(x_ref, t_ref, o_ref, *, blocks_per_core, block_rows,
                     n_valid_rows, acc_rows, needs_mask):
    c = pl.program_id(0)          # per-core partial index ("parallel" axis)
    j = pl.program_id(1)          # block index within this core ("arbitrary")

    # Resident per-core output tile: zero once per core.
    @pl.when(j == 0)
    def _():
        o_ref[...] = jnp.zeros_like(o_ref)

    x = x_ref[...]
    t = t_ref[...]
    # f32 math even for bf16 inputs (precision; v5e has no bf16 VPU/EUP).
    if x.dtype != jnp.float32:
        x = x.astype(jnp.float32)
    if t.dtype != jnp.float32:
        t = t.astype(jnp.float32)

    bt, L = x.shape

    def partial_tile(xv, tv):
        prod = jnp.log(xv) * tv                         # EUP log + VPU mul
        if acc_rows == 1:
            # Tiny single-block case (bt not a multiple of 8): one sublane reduce.
            return jnp.sum(prod, axis=0, keepdims=True)
        # (bt, L) -> (bt//8, 8, L) splits the major dim only (no relayout);
        # the sum over axis 0 is pure vreg-wise VPU adds (no XLU).
        return jnp.sum(prod.reshape(bt // acc_rows, acc_rows, L), axis=0)

    if needs_mask:
        b = c * blocks_per_core + j                     # global block index
        is_interior = (b + 1) * block_rows <= n_valid_rows

        @pl.when(is_interior)
        def _():
            o_ref[...] += partial_tile(x, t)

        @pl.when(jnp.logical_not(is_interior))
        def _():
            # Edge (partial) or ghost (fully out-of-range, clamped re-read)
            # block: invalid rows contribute log(1) * 0 == 0.  Keep BOTH
            # substitutions so OOB garbage in x cannot poison the sum.
            rid = b * block_rows + jax.lax.broadcasted_iota(jnp.int32, x.shape, 0)
            ok = rid < n_valid_rows
            xm = jnp.where(ok, x, 1.0)
            tm = jnp.where(ok, t, 0.0)
            o_ref[...] += partial_tile(xm, tm)
    else:
        o_ref[...] += partial_tile(x, t)


def soft_nll(x, target, *, block_rows=4096, num_core_partials=2,
             vmem_limit_bytes=None):
    """Pallas SoftNLL: -mean(sum(log(x) * target, axis=1)).  x, target: (N, C).

    block_rows: rows streamed per grid step (sweepable).  The default keeps
    ~8 MiB of pipelined VMEM (2 inputs x 2 buffers x 2 MiB for f32), safe under
    every generation's default scoped-VMEM limit.  On v6e raise block_rows to
    8192-16384 together with vmem_limit_bytes for a few % more; on v7x keep
    <= 8192 (64 MiB physical VMEM per TC).
    num_core_partials: size of the leading "parallel" grid axis (2 uses both
    v7x TensorCores; harmless on single-core v5e/v6e).
    """
    assert x.shape == target.shape and x.ndim == 2
    N, C = x.shape
    total = N * C
    block_rows = max(int(block_rows), _SUBLANE)

    # ---- copy-free working layout ------------------------------------------
    if total % _LANE == 0:
        R, L = total // _LANE, _LANE          # lane-dense, free contiguous reshape
        xw = x.reshape(R, L)
        tw = target.reshape(R, L)
    else:
        R, L = N, C                           # stream original layout; no pad copy
        xw = x
        tw = target

    # ---- block size: big, (8,128)-legal, capped by a VMEM budget ------------
    itemsize = max(x.dtype.itemsize, target.dtype.itemsize)
    row_bytes = _round_up(L, _LANE) * itemsize            # VMEM footprint per row
    budget = (vmem_limit_bytes or (16 << 20)) * 3 // 4    # leave pipeline headroom
    cap = max(_SUBLANE, (budget // (4 * row_bytes)) // _SUBLANE * _SUBLANE)
    bt = min(block_rows, cap)
    if R <= bt:
        bt = R                                # single block == full sublane extent
    else:
        bt = max(_SUBLANE, (bt // _SUBLANE) * _SUBLANE)
    acc_rows = _SUBLANE if bt % _SUBLANE == 0 else 1      # per-step partial tile rows

    nb = pl.cdiv(R, bt)                       # total row-blocks
    p = num_core_partials if nb >= 2 else 1   # can't split a single block
    j_per_core = pl.cdiv(nb, p)
    has_ghost = p * j_per_core != nb          # at most p-1 clamped re-reads
    needs_mask = has_ghost or (R % bt != 0)

    if has_ghost:
        def in_map(c, j):
            return (jnp.minimum(c * j_per_core + j, nb - 1), 0)
    else:
        def in_map(c, j):
            return (c * j_per_core + j, 0)

    kernel = functools.partial(
        _soft_nll_kernel,
        blocks_per_core=j_per_core, block_rows=bt,
        n_valid_rows=R, acc_rows=acc_rows, needs_mask=needs_mask)

    cp_kwargs = dict(dimension_semantics=("parallel", "arbitrary"))
    if vmem_limit_bytes is not None:
        cp_kwargs["vmem_limit_bytes"] = int(vmem_limit_bytes)

    partials = pl.pallas_call(
        kernel,
        out_shape=jax.ShapeDtypeStruct((p * acc_rows, L), jnp.float32),
        grid_spec=pltpu.PrefetchScalarGridSpec(
            num_scalar_prefetch=0,
            grid=(p, j_per_core),
            in_specs=[pl.BlockSpec((bt, L), in_map),
                      pl.BlockSpec((bt, L), in_map)],
            # One small resident partial tile per core, lane-dense write.
            out_specs=pl.BlockSpec((acc_rows, L), lambda c, j: (c, 0)),
        ),
        compiler_params=pltpu.CompilerParams(**cp_kwargs),
        cost_estimate=pl.CostEstimate(
            flops=2 * total,
            transcendentals=total,
            bytes_accessed=int(x.nbytes) + int(target.nbytes) + p * acc_rows * L * 4),
    )(xw, tw)

    # Tiny epilogue: cross-lane reduce of the per-core partials, negate, 1/N.
    return -jnp.sum(partials) / N


if __name__ == "__main__":
    key = jax.random.PRNGKey(0)
    k1, k2, k3, k4 = jax.random.split(key, 4)

    # Small shapes consistent with the module: batch=16, classes=32.
    N, C = 16, 32
    x = jax.nn.softmax(jax.random.normal(k1, (N, C), dtype=jnp.float32), axis=1)
    target = jax.nn.softmax(jax.random.normal(k2, (N, C), dtype=jnp.float32), axis=1)

    loss = jax.block_until_ready(soft_nll(x, target))
    ref = -jnp.mean(jnp.sum(jnp.log(x) * target, axis=1))
    assert jnp.allclose(loss, ref, rtol=1e-5, atol=1e-5), (loss, ref)

    # Exercise the multi-block / dual-partial / masked-ghost path at tiny cost.
    N2, C2 = 48, 64
    x2 = jax.nn.softmax(jax.random.normal(k3, (N2, C2), dtype=jnp.float32), axis=1)
    t2 = jax.nn.softmax(jax.random.normal(k4, (N2, C2), dtype=jnp.float32), axis=1)
    loss2 = jax.block_until_ready(soft_nll(x2, t2, block_rows=8))
    ref2 = -jnp.mean(jnp.sum(jnp.log(x2) * t2, axis=1))
    assert jnp.allclose(loss2, ref2, rtol=1e-5, atol=1e-5), (loss2, ref2)

    print("KERNEL_OK")
</pallas_src>

<mosaic_0001>
module attributes {stable_mosaic.version = 11 : i64} {
  func.func @_soft_nll_kernel(%arg0: i32, %arg1: i32, %arg2: memref<4x128xf32, #tpu.memory_space<vmem>>, %arg3: memref<4x128xf32, #tpu.memory_space<vmem>>, %arg4: memref<1x128xf32, #tpu.memory_space<vmem>>) attributes {dimension_semantics = [#tpu.dimension_semantics<parallel>, #tpu.dimension_semantics<arbitrary>], iteration_bounds = array<i64: 1, 1>, scalar_prefetch = 0 : i64, scratch_operands = 0 : i64, tpu.core_type = #tpu.core_type<tc>, window_params = [{transform_indices = @transform_0, window_bounds = array<i64: 4, 128>}, {transform_indices = @transform_1, window_bounds = array<i64: 4, 128>}, {transform_indices = @transform_2, window_bounds = array<i64: 1, 128>}]} {
    %c0_i32 = arith.constant 0 : i32
    %0 = arith.cmpi eq, %arg1, %c0_i32 : i32
    %1 = arith.extui %0 : i1 to i32
    %c0_i32_0 = arith.constant 0 : i32
    %2 = arith.cmpi ne, %1, %c0_i32_0 : i32
    scf.if %2 {
      %cst_8 = arith.constant 0.000000e+00 : f32
      %12 = vector.broadcast %cst_8 : f32 to vector<1x128xf32>
      %c0_9 = arith.constant 0 : index
      %c0_10 = arith.constant 0 : index
      %13 = vector.load %arg4[%c0_9, %c0_10] : memref<1x128xf32, #tpu.memory_space<vmem>>, vector<1x128xf32>
      tpu.vector_store %arg4[%c0_9, %c0_10], %12 {strides = array<i32>} : memref<1x128xf32, #tpu.memory_space<vmem>>, vector<1x128xf32>,
    } else {
    }
    %c0 = arith.constant 0 : index
    %c0_1 = arith.constant 0 : index
    %3 = vector.load %arg2[%c0, %c0_1] : memref<4x128xf32, #tpu.memory_space<vmem>>, vector<4x128xf32>
    %c0_2 = arith.constant 0 : index
    %c0_3 = arith.constant 0 : index
    %4 = vector.load %arg3[%c0_2, %c0_3] : memref<4x128xf32, #tpu.memory_space<vmem>>, vector<4x128xf32>
    %c0_4 = arith.constant 0 : index
    %c0_5 = arith.constant 0 : index
    %5 = vector.load %arg4[%c0_4, %c0_5] : memref<1x128xf32, #tpu.memory_space<vmem>>, vector<1x128xf32>
    %6 = math.log %3 : vector<4x128xf32>
    %7 = arith.mulf %6, %4 : vector<4x128xf32>
    %cst = arith.constant dense<0.000000e+00> : vector<128xf32>
    %8 = vector.multi_reduction <add>, %7, %cst [0] : vector<4x128xf32> to vector<128xf32>
    %9 = vector.shape_cast %8 : vector<128xf32> to vector<1x128xf32>
    %10 = arith.addf %5, %9 : vector<1x128xf32>
    %c0_6 = arith.constant 0 : index
    %c0_7 = arith.constant 0 : index
    %11 = vector.load %arg4[%c0_6, %c0_7] : memref<1x128xf32, #tpu.memory_space<vmem>>, vector<1x128xf32>
    tpu.vector_store %arg4[%c0_6, %c0_7], %10 {strides = array<i32>} : memref<1x128xf32, #tpu.memory_space<vmem>>, vector<1x128xf32>,
    return
  }
  func.func @transform_0(%arg0: i32, %arg1: i32) -> (i32, i32) {
    %c1_i32 = arith.constant 1 : i32
    %0 = arith.muli %arg0, %c1_i32 : i32
    %1 = arith.addi %0, %arg1 : i32
    %c0_i32 = arith.constant 0 : i32
    %c0_i32_0 = arith.constant 0 : i32
    return %1, %c0_i32 : i32, i32
  }
  func.func @transform_1(%arg0: i32, %arg1: i32) -> (i32, i32) {
    %c1_i32 = arith.constant 1 : i32
    %0 = arith.muli %arg0, %c1_i32 : i32
    %1 = arith.addi %0, %arg1 : i32
    %c0_i32 = arith.constant 0 : i32
    %c0_i32_0 = arith.constant 0 : i32
    return %1, %c0_i32 : i32, i32
  }
  func.func @transform_2(%arg0: i32, %arg1: i32) -> (i32, i32) {
    %c0_i32 = arith.constant 0 : i32
    %c0_i32_0 = arith.constant 0 : i32
    return %arg0, %c0_i32 : i32, i32
  }
}

</mosaic_0001>

<bundles_post_ra>
// kernel: tpu_custom_call.1
= control target key start
LH: loop header
LB: loop body
LE: loop exit
PB: predicated region body
PF: predicated region fallthrough
CT: control target
= control target key end

     0   :  { %7 = vsyncpa [#allocation3], 0  ;;  %s214_s0 = inlined_call_operand.hbm [shape: f32[4,128], index: 0, kind: input, shape index: {}]   ;;  %s215_s1 = inlined_call_operand.hbm [shape: f32[4,128], index: 1, kind: input, shape index: {}]   ;;  %s216_s2 = inlined_call_operand.hbm [shape: f32[1,128], index: 2, kind: output, shape index: {}]  }
   0x1   :  { %8 = vsyncpa [#allocation6], 0 }
   0x2   :  { %9 = vsyncpa [#allocation4], 0  ;;  %s159_s9 = smov [#allocation2]   ;;  %s160_s11 = smov [#allocation5]  }
   0x3   :  { %s19_s10 = sshll.u32 %s159_s9, 4  ;;  %s32_s12 = sshll.u32 %s160_s11, 4  ;;  %s20_s10 = int_to_ptr.vmem [resolvable:$true] %s19_s10  ;;  %s33_s12 = int_to_ptr.vmem [resolvable:$true] %s32_s12 }
   0x4   :  { %s87_s15 = scalar_lea.hbm %s214_s0, 64 }
   0x5   :  { %p88_p0 = scmp.ne.s32.totalorder %s214_s0, %s87_s15  ;;  %p91_p1 = scmp.lt.u32.totalorder %s87_s15, %s214_s0 }
   0x7   :  { %p93_p2 = pnand %p91_p1, %p88_p0 }
   0x9   :  { %96 = shalt.err (!%p93_p2)
}
   0xa   :  { %s97_s20 = scalar_lea.vmem %s20_s10, 64  ;;  %p102_p4 = scmp.lt.s32.totalorder %s20_s10, %s20_s10 }
   0xb   :  { %p98_p3 = scmp.ne.s32.totalorder %s20_s10, %s97_s20  ;;  %p103_p5 = scmp.lt.s32.totalorder %s97_s20, %s97_s20 }
   0xd   :  { %p104_p6 = por %p103_p5, %p102_p4 }
   0xf   :  { %p105_p7 = pnand %p104_p6, %p98_p3 }
  0x11   :  { %108 = shalt.err (!%p105_p7)
}
  0x12   :  { %22 = dma.hbm_to_vmem [thread:$0]  %s214_s0, 64, %s20_s10, [#allocation3]  }
  0x13   :  { %s109_s25 = scalar_lea.hbm %s215_s1, 64 }
  0x14   :  { %p110_p8 = scmp.ne.s32.totalorder %s215_s1, %s109_s25  ;;  %p113_p9 = scmp.lt.u32.totalorder %s109_s25, %s215_s1 }
  0x16   :  { %p115_p10 = pnand %p113_p9, %p110_p8 }
  0x18   :  { %118 = shalt.err (!%p115_p10)
}
  0x19   :  { %s119_s30 = scalar_lea.vmem %s33_s12, 64  ;;  %p124_p12 = scmp.lt.s32.totalorder %s33_s12, %s33_s12 }
  0x1a   :  { %p120_p11 = scmp.ne.s32.totalorder %s33_s12, %s119_s30  ;;  %p125_p13 = scmp.lt.s32.totalorder %s119_s30, %s119_s30 }
  0x1c   :  { %p126_p0 = por %p125_p13, %p124_p12 }
  0x1e   :  { %p127_p1 = pnand %p126_p0, %p120_p11 }
  0x20   :  { %130 = shalt.err (!%p127_p1)
}
  0x21   :  { %35 = dma.hbm_to_vmem [thread:$0]  %s215_s1, 64, %s33_s12, [#allocation6]  }
  0x22   :  { %153 = dma.done.wait [#allocation3], 64  }
  0x23   :  { %154 = vsyncadd [#allocation3], 4294967232 }
  0x24   :  { %155 = dma.done.wait [#allocation6], 64  }
  0x25   :  { %156 = vsyncadd [#allocation6], 4294967232  ;;  %v161_v0 = vmov 0.0   ;;  %v49_v1 = vld [vmem:[#allocation2] sm:$0xf]  ;;  %vm55_vm0 = vcmask 1043456  }
  0x26   :  { %48 = vst [vmem:[#allocation7] sm:$0x1] %v161_v0  ;;  %85 = vlog2.f32 %v49_v1  ;;  %v50_v3 = vld [vmem:[#allocation5] sm:$0xf]  ;;  %s162_s1 = smov [#allocation7]  }
  0x27   :  { %s71_s4 = sshll.u32 %s162_s1, 4  ;;  %s72_s4 = int_to_ptr.vmem [resolvable:$true] %s71_s4 }
  0x28   :  { %s131_s5 = scalar_lea.vmem %s72_s4, 16  ;;  %s135_s6 = scalar_lea.vmem %s72_s4, 32 }
  0x29   :  { %p132_p2 = scmp.ne.s32.totalorder %s72_s4, %s131_s5  ;;  %p136_p3 = scmp.lt.s32.totalorder %s72_s4, %s72_s4 }
  0x2a   :  { %p137_p4 = scmp.lt.s32.totalorder %s135_s6, %s131_s5 }
  0x2c   :  { %p138_p5 = por %p137_p4, %p136_p3 }
  0x2d   :  { %v51_v12 = vld [vmem:[#allocation7] sm:$0x1] }
  0x2e   :  { %p139_p6 = pnand %p138_p5, %p132_p2 }
  0x30   :  { %v86_v2 = vpop.eup %85 }
  0x31   :  { %v53_v4 = vmul.f32 0.6931472, %v86_v2 }
  0x33   :  { %v54_v5 = vmul.f32 %v53_v4, %v50_v3 }
  0x35   :  { %v56_v6 = vsel %vm55_vm0, %v54_v5, 0.0 }
  0x36   :  { %v57_v7 = vrot.slane %v56_v6, 4 }
  0x38   :  { %v58_v8 = vadd.f32 %v57_v7, %v56_v6 }
  0x3a   :  { %v59_v9 = vrot.slane %v58_v8, 2 }
  0x3c   :  { %v60_v10 = vadd.f32 %v59_v9, %v58_v8 }
  0x3e   :  { %v61_v11 = vrot.slane %v60_v10, 1 }
  0x40   :  { %v62_v13 = vadd.f32 %v61_v11, %v60_v10 }
  0x42   :  { %v63_v14 = vadd.f32 %v62_v13, %v51_v12 }
  0x44   :  { %64 = vst [vmem:[#allocation7] sm:$0x1] %v63_v14 }
  0x45   :  { %142 = shalt.err (!%p139_p6)
}
  0x46   :  { %s143_s9 = scalar_lea.hbm %s216_s2, 16 }
  0x47   :  { %p144_p7 = scmp.ne.s32.totalorder %s216_s2, %s143_s9  ;;  %p147_p8 = scmp.lt.u32.totalorder %s143_s9, %s216_s2 }
  0x49   :  { %p149_p9 = pnand %p147_p8, %p144_p7 }
  0x4b   :  { %152 = shalt.err (!%p149_p9)
}
  0x4c   :  { %74 = dma.vmem_to_hbm [thread:$0]  %s72_s4, 16, %s216_s2, [#allocation4]  }
  0x4d   :  { %157 = dma.done.wait [#allocation4], 16  }
  0x4e   :  { %158 = vsyncadd [#allocation4], 4294967280 }
  0x4f   :  { %78 = vsyncpa [#allocation3], 1 }
  0x50   :  { %79 = vsyncpa [#allocation6], 1 }
  0x51   :  { %80 = vsyncpa [#allocation4], 1 }

</bundles_post_ra>
